<compile_context>
chip_gen: v6e
topology: v6e:2x2x1
jax: 0.10.0
libtpu: 0.0.40
codegen_flags: <defaults>
</compile_context>

<pallas_src>
import jax
import jax.numpy as jnp
from jax.experimental import pallas as pl
from jax.experimental.pallas import tpu as pltpu

EPS = 1e-5


# ----------------------------------------------------------------------------
# Fused whole-block kernel body.  Grid = (batch_groups, num_layers).
# For each group, the (c_total, lanes) output block stays resident in VMEM
# across the layer axis and acts as the DenseNet feature buffer
# (channels on sublanes, batch*H*W on lanes).
# ----------------------------------------------------------------------------
def _make_block_kernel(c0, growth, cmid, c_total, W, lanes):

    def kernel(x0_ref, w1_ref, sb_ref, b2_ref, w2_ref, mask_ref,
               out_ref, tap_ref):
        layer = pl.program_id(1)

        # ---- layer 0: initialize the feature buffer for this batch group ---
        @pl.when(layer == 0)
        def _init():
            out_ref[...] = jnp.zeros_like(out_ref)
            out_ref[pl.ds(0, c0), :] = x0_ref[...]

        # ---- BN1 (eval mode, folded) + ReLU1 on the whole buffer -----------
        # Channels >= cin hold zeros AND have zero scale/bias AND zero conv1
        # columns, so they contribute nothing: no dynamic-K slicing needed.
        feat = out_ref[...]                              # (c_total, lanes) f32
        sb = sb_ref[0]                                   # (2, c_total, 1)
        a = jnp.maximum(feat * sb[0] + sb[1], 0.0)

        # ---- conv1 (1x1) with BN2 scale pre-folded, + BN2 bias, ReLU2 ------
        bott = jnp.dot(w1_ref[0], a, preferred_element_type=jnp.float32)
        bott = jnp.maximum(bott + b2_ref[0], 0.0)        # (cmid, lanes) f32

        # ---- conv2 (3x3, pad=1) as ONE im2col matmul ------------------------
        # Each tap = static lane shift of the resident bottleneck times a
        # precomputed border mask (implements zero padding and prevents rolls
        # leaking across the images that share the lane axis).
        t = 0
        for dh in (-1, 0, 1):
            for dw in (-1, 0, 1):
                shift = -(dh * W + dw)
                tap = jnp.roll(bott, shift, axis=1) if shift else bott
                tap_ref[pl.ds(t * cmid, cmid), :] = tap * mask_ref[t]
                t += 1
        newf = jnp.dot(w2_ref[0], tap_ref[...],
                       preferred_element_type=jnp.float32)   # (growth, lanes)

        # ---- append the growth_rate new channels in place -------------------
        cin = pl.multiple_of(c0 + layer * growth, 8)
        out_ref[pl.ds(cin, growth), :] = newf

    return kernel


# ----------------------------------------------------------------------------
# _DenseBlock.forward : returns torch.cat(features, 1) in NCHW.
# ----------------------------------------------------------------------------
@jax.jit
def dense_block_forward(x_nchw, packed):
    N, c0, H, W = x_nchw.shape
    L, cmid, c_total = packed["w1s"].shape
    growth = packed["w2s"].shape[1]
    assert c_total == c0 + L * growth
    HW = H * W

    # Parallel batch-group axis (feeds v7x's 2nd TensorCore); batch *within*
    # a group is folded into the lane axis for wider, denser matmuls.
    n_groups = 2 if (N >= 2 and N % 2 == 0) else 1
    gsz = N // n_groups
    lanes = gsz * HW
    if lanes % 128 or c0 % 8 or growth % 8 or cmid % 8 or c_total % 8:
        # TODO(synk): pad channels / spatial for unaligned configurations.
        raise NotImplementedError("unaligned channel / spatial sizes")

    # Input features in (C, N*H*W) layout: lane index = n*HW + h*W + w.
    x0 = x_nchw.astype(jnp.float32).transpose(1, 0, 2, 3).reshape(c0, N * HW)

    # Precomputed 3x3 zero-padding border masks, (9, 1, lanes), tiled per image.
    hh = jnp.arange(H).reshape(H, 1)
    ww = jnp.arange(W).reshape(1, W)
    rows = []
    for dh in (-1, 0, 1):
        for dw in (-1, 0, 1):
            valid = ((hh + dh >= 0) & (hh + dh < H) &
                     (ww + dw >= 0) & (ww + dw < W))
            rows.append(valid.reshape(-1))
    masks = jnp.stack(rows).astype(jnp.float32)              # (9, HW)
    masks = jnp.tile(masks, (1, gsz)).reshape(9, 1, lanes)

    kernel = _make_block_kernel(c0, growth, cmid, c_total, W, lanes)
    out = pl.pallas_call(
        kernel,
        out_shape=jax.ShapeDtypeStruct((c_total, N * HW), jnp.float32),
        grid_spec=pltpu.PrefetchScalarGridSpec(
            num_scalar_prefetch=0,
            grid=(n_groups, L),
            in_specs=[
                pl.BlockSpec((c0, lanes), lambda s, l: (0, s)),
                pl.BlockSpec((1, cmid, c_total), lambda s, l: (l, 0, 0)),
                pl.BlockSpec((1, 2, c_total, 1), lambda s, l: (l, 0, 0, 0)),
                pl.BlockSpec((1, cmid, 1), lambda s, l: (l, 0, 0)),
                pl.BlockSpec((1, growth, 9 * cmid), lambda s, l: (l, 0, 0)),
                pl.BlockSpec((9, 1, lanes), lambda s, l: (0, 0, 0)),
            ],
            # Feature buffer: resident across the layer axis, flushed to HBM
            # once per batch group.
            out_specs=pl.BlockSpec((c_total, lanes), lambda s, l: (0, s)),
            scratch_shapes=[pltpu.VMEM((9 * cmid, lanes), jnp.float32)],
        ),
        compiler_params=pltpu.CompilerParams(
            dimension_semantics=("parallel", "arbitrary")),
    )(x0, packed["w1s"], packed["sb1"], packed["b2s"], packed["w2s"], masks)

    return out.reshape(c_total, N, H, W).transpose(1, 0, 2, 3)


# ----------------------------------------------------------------------------
# Parameters: deterministic, shapes follow _DenseLayer.__init__, eval-mode BN
# folded to per-channel (scale, bias).
# ----------------------------------------------------------------------------
def init_dense_block_params(key, num_layers, num_input_features, bn_size,
                            growth_rate):
    params = []
    for i in range(num_layers):
        cin = num_input_features + i * growth_rate
        cmid = bn_size * growth_rate
        ks = jax.random.split(jax.random.fold_in(key, i), 10)
        g1 = 1.0 + 0.1 * jax.random.normal(ks[0], (cin,), jnp.float32)
        be1 = 0.1 * jax.random.normal(ks[1], (cin,), jnp.float32)
        rm1 = 0.1 * jax.random.normal(ks[2], (cin,), jnp.float32)
        rv1 = jax.random.uniform(ks[3], (cin,), jnp.float32, 0.5, 1.5)
        w1 = jax.random.normal(ks[4], (cin, cmid), jnp.float32) * (2.0 / cin) ** 0.5
        g2 = 1.0 + 0.1 * jax.random.normal(ks[5], (cmid,), jnp.float32)
        be2 = 0.1 * jax.random.normal(ks[6], (cmid,), jnp.float32)
        rm2 = 0.1 * jax.random.normal(ks[7], (cmid,), jnp.float32)
        rv2 = jax.random.uniform(ks[8], (cmid,), jnp.float32, 0.5, 1.5)
        w2 = jax.random.normal(ks[9], (3, 3, cmid, growth_rate),
                               jnp.float32) * (2.0 / (9 * cmid)) ** 0.5
        s1 = g1 / jnp.sqrt(rv1 + EPS)
        b1 = be1 - rm1 * s1
        s2 = g2 / jnp.sqrt(rv2 + EPS)
        b2 = be2 - rm2 * s2
        params.append(dict(w1=w1, w2=w2, s1=s1, b1=b1, s2=s2, b2=b2))
    return params


def pack_params_for_kernel(params, num_input_features):
    """Stack per-layer params into kernel-layout arrays.

    w1s (L, cmid, c_total): conv1 weight^T with BN2 scale folded in and input
        channels zero-padded to c_total (layer-independent matmul K).
    sb1 (L, 2, c_total, 1): BN1 (scale, bias), zero-padded.
    b2s (L, cmid, 1): BN2 bias.
    w2s (L, growth, 9*cmid): conv2 weight folded for the single im2col matmul.
    """
    L = len(params)
    c0 = num_input_features
    cmid = params[0]["w1"].shape[1]
    growth = params[0]["w2"].shape[3]
    c_total = c0 + L * growth
    w1s, sbs, b2s, w2s = [], [], [], []
    for i, p in enumerate(params):
        cin = c0 + i * growth
        w1f = p["s2"][:, None] * p["w1"].T                     # (cmid, cin)
        w1s.append(jnp.pad(w1f, ((0, 0), (0, c_total - cin))))
        s1p = jnp.pad(p["s1"], (0, c_total - cin))
        b1p = jnp.pad(p["b1"], (0, c_total - cin))
        sbs.append(jnp.stack([s1p, b1p]).reshape(2, c_total, 1))
        b2s.append(p["b2"].reshape(cmid, 1))
        w2s.append(jnp.transpose(p["w2"], (3, 0, 1, 2)).reshape(growth, 9 * cmid))
    return dict(w1s=jnp.stack(w1s), sb1=jnp.stack(sbs),
                b2s=jnp.stack(b2s), w2s=jnp.stack(w2s))


# ----------------------------------------------------------------------------
# Pure-JAX f32 reference (NCHW) of the eval-mode torch module.
# ----------------------------------------------------------------------------
def _ref_forward(x_nchw, params, growth_rate):
    x = x_nchw.astype(jnp.float32)
    N, _, H, W = x.shape
    feats = [x]
    for p in params:
        cat = jnp.concatenate(feats, axis=1)
        a = jnp.maximum(cat * p["s1"][None, :, None, None]
                        + p["b1"][None, :, None, None], 0.0)
        bott = jnp.einsum("nchw,cd->ndhw", a, p["w1"], precision="highest")
        b = jnp.maximum(bott * p["s2"][None, :, None, None]
                        + p["b2"][None, :, None, None], 0.0)
        bp = jnp.pad(b, ((0, 0), (0, 0), (1, 1), (1, 1)))
        nf = jnp.zeros((N, growth_rate, H, W), jnp.float32)
        for kh in range(3):
            for kw in range(3):
                nf = nf + jnp.einsum("nchw,cg->nghw",
                                     bp[:, :, kh:kh + H, kw:kw + W],
                                     p["w2"][kh, kw], precision="highest")
        feats.append(nf)
    return jnp.concatenate(feats, axis=1)


if __name__ == "__main__":
    num_layers, num_input_features, bn_size, growth_rate = 3, 8, 2, 8
    N, H, W = 2, 16, 16

    key = jax.random.PRNGKey(0)
    kx, kp = jax.random.split(key)
    x = jax.random.normal(kx, (N, num_input_features, H, W), jnp.float32)
    params = init_dense_block_params(kp, num_layers, num_input_features,
                                     bn_size, growth_rate)
    packed = pack_params_for_kernel(params, num_input_features)

    out = jax.block_until_ready(dense_block_forward(x, packed))

    expected_c = num_input_features + num_layers * growth_rate
    assert out.shape == (N, expected_c, H, W), out.shape
    assert bool(jnp.all(jnp.isfinite(out)))

    # The first c0 channels of the concatenated output are the input itself.
    assert jnp.allclose(out[:, :num_input_features], x, atol=1e-6, rtol=1e-6)

    # Full check against true f32 eval-mode module semantics (tolerance only
    # absorbs matmul accumulation-order / MXU pass differences).
    ref = _ref_forward(x, params, growth_rate)
    max_err = float(jnp.max(jnp.abs(out - ref)))
    assert jnp.allclose(out, ref, atol=5e-2, rtol=5e-2), max_err

    print("KERNEL_OK")
</pallas_src>

<mosaic_0001>
module attributes {stable_mosaic.version = 11 : i64} {
  func.func @kernel(%arg0: i32, %arg1: i32, %arg2: memref<8x256xf32, #tpu.memory_space<vmem>>, %arg3: memref<1x16x32xf32, #tpu.memory_space<vmem>>, %arg4: memref<1x2x32x1xf32, #tpu.memory_space<vmem>>, %arg5: memref<1x16x1xf32, #tpu.memory_space<vmem>>, %arg6: memref<1x8x144xf32, #tpu.memory_space<vmem>>, %arg7: memref<9x1x256xf32, #tpu.memory_space<vmem>>, %arg8: memref<32x256xf32, #tpu.memory_space<vmem>>, %arg9: memref<144x256xf32, #tpu.memory_space<vmem>>) attributes {dimension_semantics = [#tpu.dimension_semantics<parallel>, #tpu.dimension_semantics<arbitrary>], iteration_bounds = array<i64: 2, 3>, scalar_prefetch = 0 : i64, scratch_operands = 1 : i64, tpu.core_type = #tpu.core_type<tc>, window_params = [{transform_indices = @transform_0, window_bounds = array<i64: 8, 256>}, {transform_indices = @transform_1, window_bounds = array<i64: 1, 16, 32>}, {transform_indices = @transform_2, window_bounds = array<i64: 1, 2, 32, 1>}, {transform_indices = @transform_3, window_bounds = array<i64: 1, 16, 1>}, {transform_indices = @transform_4, window_bounds = array<i64: 1, 8, 144>}, {pipeline_mode = #tpu.pipeline_mode<synchronous>, transform_indices = @transform_5, window_bounds = array<i64: 9, 1, 256>}, {transform_indices = @transform_6, window_bounds = array<i64: 32, 256>}]} {
    %c0_i32 = arith.constant 0 : i32
    %0 = arith.cmpi eq, %arg1, %c0_i32 : i32
    %1 = arith.extui %0 : i1 to i32
    %c0_i32_0 = arith.constant 0 : i32
    %2 = arith.cmpi ne, %1, %c0_i32_0 : i32
    scf.if %2 {
      %cst_51 = arith.constant 0.000000e+00 : f32
      %103 = vector.broadcast %cst_51 : f32 to vector<32x256xf32>
      %c0_52 = arith.constant 0 : index
      %c0_53 = arith.constant 0 : index
      %104 = vector.load %arg8[%c0_52, %c0_53] : memref<32x256xf32, #tpu.memory_space<vmem>>, vector<32x256xf32>
      tpu.vector_store %arg8[%c0_52, %c0_53], %103 {strides = array<i32>} : memref<32x256xf32, #tpu.memory_space<vmem>>, vector<32x256xf32>,
      %c0_54 = arith.constant 0 : index
      %c0_55 = arith.constant 0 : index
      %105 = vector.load %arg2[%c0_54, %c0_55] : memref<8x256xf32, #tpu.memory_space<vmem>>, vector<8x256xf32>
      %c0_56 = arith.constant 0 : index
      %c0_57 = arith.constant 0 : index
      %106 = vector.load %arg8[%c0_56, %c0_57] : memref<32x256xf32, #tpu.memory_space<vmem>>, vector<8x256xf32>
      tpu.vector_store %arg8[%c0_56, %c0_57], %105 {strides = array<i32>} : memref<32x256xf32, #tpu.memory_space<vmem>>, vector<8x256xf32>,
    } else {
    }
    %c0 = arith.constant 0 : index
    %c0_1 = arith.constant 0 : index
    %3 = vector.load %arg8[%c0, %c0_1] : memref<32x256xf32, #tpu.memory_space<vmem>>, vector<32x256xf32>
    %c0_2 = arith.constant 0 : index
    %c0_3 = arith.constant 0 : index
    %c0_4 = arith.constant 0 : index
    %c0_5 = arith.constant 0 : index
    %4 = vector.load %arg4[%c0_2, %c0_3, %c0_4, %c0_5] : memref<1x2x32x1xf32, #tpu.memory_space<vmem>>, vector<1x2x32x1xf32>
    %5 = vector.shape_cast %4 : vector<1x2x32x1xf32> to vector<2x32x1xf32>
    %6 = vector.extract_strided_slice %5 {offsets = [0, 0, 0], sizes = [1, 32, 1], strides = [1, 1, 1]} : vector<2x32x1xf32> to vector<1x32x1xf32>
    %7 = vector.shape_cast %6 : vector<1x32x1xf32> to vector<32x1xf32>
    %8 = vector.broadcast %7 : vector<32x1xf32> to vector<32x256xf32>
    %9 = arith.mulf %3, %8 : vector<32x256xf32>
    %10 = vector.extract_strided_slice %5 {offsets = [1, 0, 0], sizes = [1, 32, 1], strides = [1, 1, 1]} : vector<2x32x1xf32> to vector<1x32x1xf32>
    %11 = vector.shape_cast %10 : vector<1x32x1xf32> to vector<32x1xf32>
    %12 = vector.broadcast %11 : vector<32x1xf32> to vector<32x256xf32>
    %13 = arith.addf %9, %12 : vector<32x256xf32>
    %cst = arith.constant 0.000000e+00 : f32
    %14 = vector.broadcast %cst : f32 to vector<32x256xf32>
    %15 = arith.maximumf %13, %14 : vector<32x256xf32>
    %c0_6 = arith.constant 0 : index
    %c0_7 = arith.constant 0 : index
    %c0_8 = arith.constant 0 : index
    %16 = vector.load %arg3[%c0_6, %c0_7, %c0_8] : memref<1x16x32xf32, #tpu.memory_space<vmem>>, vector<1x16x32xf32>
    %17 = vector.shape_cast %16 : vector<1x16x32xf32> to vector<16x32xf32>
    %cst_9 = arith.constant dense<0.000000e+00> : vector<16x256xf32>
    %18 = tpu.matmul %17, %15, %cst_9 {dimension_numbers = #tpu.dot_dimension_numbers<[1], [0], [0], [1], [0, 0, 1, 1], [], []>} : vector<16x32xf32>, vector<32x256xf32>, vector<16x256xf32> -> vector<16x256xf32>
    %c0_10 = arith.constant 0 : index
    %c0_11 = arith.constant 0 : index
    %c0_12 = arith.constant 0 : index
    %19 = vector.load %arg5[%c0_10, %c0_11, %c0_12] : memref<1x16x1xf32, #tpu.memory_space<vmem>>, vector<1x16x1xf32>
    %20 = vector.shape_cast %19 : vector<1x16x1xf32> to vector<16x1xf32>
    %21 = vector.broadcast %20 : vector<16x1xf32> to vector<16x256xf32>
    %22 = arith.addf %18, %21 : vector<16x256xf32>
    %cst_13 = arith.constant 0.000000e+00 : f32
    %23 = vector.broadcast %cst_13 : f32 to vector<16x256xf32>
    %24 = arith.maximumf %22, %23 : vector<16x256xf32>
    %25 = vector.extract_strided_slice %24 {offsets = [0, 239], sizes = [16, 17], strides = [1, 1]} : vector<16x256xf32> to vector<16x17xf32>
    %26 = vector.extract_strided_slice %24 {offsets = [0, 0], sizes = [16, 239], strides = [1, 1]} : vector<16x256xf32> to vector<16x239xf32>
    %27 = tpu.concatenate %25, %26 in 1 : vector<16x17xf32>, vector<16x239xf32> -> vector<16x256xf32>
    %c0_14 = arith.constant 0 : index
    %c0_15 = arith.constant 0 : index
    %c0_16 = arith.constant 0 : index
    %28 = vector.load %arg7[%c0_14, %c0_15, %c0_16] : memref<9x1x256xf32, #tpu.memory_space<vmem>>, vector<1x1x256xf32>
    %29 = vector.shape_cast %28 : vector<1x1x256xf32> to vector<1x256xf32>
    %30 = vector.broadcast %29 : vector<1x256xf32> to vector<16x256xf32>
    %31 = arith.mulf %27, %30 : vector<16x256xf32>
    %c0_17 = arith.constant 0 : index
    %c0_18 = arith.constant 0 : index
    %32 = vector.load %arg9[%c0_17, %c0_18] : memref<144x256xf32, #tpu.memory_space<vmem>>, vector<16x256xf32>
    tpu.vector_store %arg9[%c0_17, %c0_18], %31 {strides = array<i32>} : memref<144x256xf32, #tpu.memory_space<vmem>>, vector<16x256xf32>,
    %33 = vector.extract_strided_slice %24 {offsets = [0, 240], sizes = [16, 16], strides = [1, 1]} : vector<16x256xf32> to vector<16x16xf32>
    %34 = vector.extract_strided_slice %24 {offsets = [0, 0], sizes = [16, 240], strides = [1, 1]} : vector<16x256xf32> to vector<16x240xf32>
    %35 = tpu.concatenate %33, %34 in 1 : vector<16x16xf32>, vector<16x240xf32> -> vector<16x256xf32>
    %c1 = arith.constant 1 : index
    %c0_19 = arith.constant 0 : index
    %c0_20 = arith.constant 0 : index
    %36 = vector.load %arg7[%c1, %c0_19, %c0_20] : memref<9x1x256xf32, #tpu.memory_space<vmem>>, vector<1x1x256xf32>
    %37 = vector.shape_cast %36 : vector<1x1x256xf32> to vector<1x256xf32>
    %38 = vector.broadcast %37 : vector<1x256xf32> to vector<16x256xf32>
    %39 = arith.mulf %35, %38 : vector<16x256xf32>
    %c16 = arith.constant 16 : index
    %c0_21 = arith.constant 0 : index
    %40 = vector.load %arg9[%c16, %c0_21] : memref<144x256xf32, #tpu.memory_space<vmem>>, vector<16x256xf32>
    tpu.vector_store %arg9[%c16, %c0_21], %39 {strides = array<i32>} : memref<144x256xf32, #tpu.memory_space<vmem>>, vector<16x256xf32>,
    %41 = vector.extract_strided_slice %24 {offsets = [0, 241], sizes = [16, 15], strides = [1, 1]} : vector<16x256xf32> to vector<16x15xf32>
    %42 = vector.extract_strided_slice %24 {offsets = [0, 0], sizes = [16, 241], strides = [1, 1]} : vector<16x256xf32> to vector<16x241xf32>
    %43 = tpu.concatenate %41, %42 in 1 : vector<16x15xf32>, vector<16x241xf32> -> vector<16x256xf32>
    %c2 = arith.constant 2 : index
    %c0_22 = arith.constant 0 : index
    %c0_23 = arith.constant 0 : index
    %44 = vector.load %arg7[%c2, %c0_22, %c0_23] : memref<9x1x256xf32, #tpu.memory_space<vmem>>, vector<1x1x256xf32>
    %45 = vector.shape_cast %44 : vector<1x1x256xf32> to vector<1x256xf32>
    %46 = vector.broadcast %45 : vector<1x256xf32> to vector<16x256xf32>
    %47 = arith.mulf %43, %46 : vector<16x256xf32>
    %c32 = arith.constant 32 : index
    %c0_24 = arith.constant 0 : index
    %48 = vector.load %arg9[%c32, %c0_24] : memref<144x256xf32, #tpu.memory_space<vmem>>, vector<16x256xf32>
    tpu.vector_store %arg9[%c32, %c0_24], %47 {strides = array<i32>} : memref<144x256xf32, #tpu.memory_space<vmem>>, vector<16x256xf32>,
    %49 = vector.extract_strided_slice %24 {offsets = [0, 255], sizes = [16, 1], strides = [1, 1]} : vector<16x256xf32> to vector<16x1xf32>
    %50 = vector.extract_strided_slice %24 {offsets = [0, 0], sizes = [16, 255], strides = [1, 1]} : vector<16x256xf32> to vector<16x255xf32>
    %51 = tpu.concatenate %49, %50 in 1 : vector<16x1xf32>, vector<16x255xf32> -> vector<16x256xf32>
    %c3 = arith.constant 3 : index
    %c0_25 = arith.constant 0 : index
    %c0_26 = arith.constant 0 : index
    %52 = vector.load %arg7[%c3, %c0_25, %c0_26] : memref<9x1x256xf32, #tpu.memory_space<vmem>>, vector<1x1x256xf32>
    %53 = vector.shape_cast %52 : vector<1x1x256xf32> to vector<1x256xf32>
    %54 = vector.broadcast %53 : vector<1x256xf32> to vector<16x256xf32>
    %55 = arith.mulf %51, %54 : vector<16x256xf32>
    %c48 = arith.constant 48 : index
    %c0_27 = arith.constant 0 : index
    %56 = vector.load %arg9[%c48, %c0_27] : memref<144x256xf32, #tpu.memory_space<vmem>>, vector<16x256xf32>
    tpu.vector_store %arg9[%c48, %c0_27], %55 {strides = array<i32>} : memref<144x256xf32, #tpu.memory_space<vmem>>, vector<16x256xf32>,
    %c4 = arith.constant 4 : index
    %c0_28 = arith.constant 0 : index
    %c0_29 = arith.constant 0 : index
    %57 = vector.load %arg7[%c4, %c0_28, %c0_29] : memref<9x1x256xf32, #tpu.memory_space<vmem>>, vector<1x1x256xf32>
    %58 = vector.shape_cast %57 : vector<1x1x256xf32> to vector<1x256xf32>
    %59 = vector.broadcast %58 : vector<1x256xf32> to vector<16x256xf32>
    %60 = arith.mulf %24, %59 : vector<16x256xf32>
    %c64 = arith.constant 64 : index
    %c0_30 = arith.constant 0 : index
    %61 = vector.load %arg9[%c64, %c0_30] : memref<144x256xf32, #tpu.memory_space<vmem>>, vector<16x256xf32>
    tpu.vector_store %arg9[%c64, %c0_30], %60 {strides = array<i32>} : memref<144x256xf32, #tpu.memory_space<vmem>>, vector<16x256xf32>,
    %62 = vector.extract_strided_slice %24 {offsets = [0, 1], sizes = [16, 255], strides = [1, 1]} : vector<16x256xf32> to vector<16x255xf32>
    %63 = vector.extract_strided_slice %24 {offsets = [0, 0], sizes = [16, 1], strides = [1, 1]} : vector<16x256xf32> to vector<16x1xf32>
    %64 = tpu.concatenate %62, %63 in 1 : vector<16x255xf32>, vector<16x1xf32> -> vector<16x256xf32>
    %c5 = arith.constant 5 : index
    %c0_31 = arith.constant 0 : index
    %c0_32 = arith.constant 0 : index
    %65 = vector.load %arg7[%c5, %c0_31, %c0_32] : memref<9x1x256xf32, #tpu.memory_space<vmem>>, vector<1x1x256xf32>
    %66 = vector.shape_cast %65 : vector<1x1x256xf32> to vector<1x256xf32>
    %67 = vector.broadcast %66 : vector<1x256xf32> to vector<16x256xf32>
    %68 = arith.mulf %64, %67 : vector<16x256xf32>
    %c80 = arith.constant 80 : index
    %c0_33 = arith.constant 0 : index
    %69 = vector.load %arg9[%c80, %c0_33] : memref<144x256xf32, #tpu.memory_space<vmem>>, vector<16x256xf32>
    tpu.vector_store %arg9[%c80, %c0_33], %68 {strides = array<i32>} : memref<144x256xf32, #tpu.memory_space<vmem>>, vector<16x256xf32>,
    %70 = vector.extract_strided_slice %24 {offsets = [0, 15], sizes = [16, 241], strides = [1, 1]} : vector<16x256xf32> to vector<16x241xf32>
    %71 = vector.extract_strided_slice %24 {offsets = [0, 0], sizes = [16, 15], strides = [1, 1]} : vector<16x256xf32> to vector<16x15xf32>
    %72 = tpu.concatenate %70, %71 in 1 : vector<16x241xf32>, vector<16x15xf32> -> vector<16x256xf32>
    %c6 = arith.constant 6 : index
    %c0_34 = arith.constant 0 : index
    %c0_35 = arith.constant 0 : index
    %73 = vector.load %arg7[%c6, %c0_34, %c0_35] : memref<9x1x256xf32, #tpu.memory_space<vmem>>, vector<1x1x256xf32>
    %74 = vector.shape_cast %73 : vector<1x1x256xf32> to vector<1x256xf32>
    %75 = vector.broadcast %74 : vector<1x256xf32> to vector<16x256xf32>
    %76 = arith.mulf %72, %75 : vector<16x256xf32>
    %c96 = arith.constant 96 : index
    %c0_36 = arith.constant 0 : index
    %77 = vector.load %arg9[%c96, %c0_36] : memref<144x256xf32, #tpu.memory_space<vmem>>, vector<16x256xf32>
    tpu.vector_store %arg9[%c96, %c0_36], %76 {strides = array<i32>} : memref<144x256xf32, #tpu.memory_space<vmem>>, vector<16x256xf32>,
    %78 = vector.extract_strided_slice %24 {offsets = [0, 16], sizes = [16, 240], strides = [1, 1]} : vector<16x256xf32> to vector<16x240xf32>
    %79 = vector.extract_strided_slice %24 {offsets = [0, 0], sizes = [16, 16], strides = [1, 1]} : vector<16x256xf32> to vector<16x16xf32>
    %80 = tpu.concatenate %78, %79 in 1 : vector<16x240xf32>, vector<16x16xf32> -> vector<16x256xf32>
    %c7 = arith.constant 7 : index
    %c0_37 = arith.constant 0 : index
    %c0_38 = arith.constant 0 : index
    %81 = vector.load %arg7[%c7, %c0_37, %c0_38] : memref<9x1x256xf32, #tpu.memory_space<vmem>>, vector<1x1x256xf32>
    %82 = vector.shape_cast %81 : vector<1x1x256xf32> to vector<1x256xf32>
    %83 = vector.broadcast %82 : vector<1x256xf32> to vector<16x256xf32>
    %84 = arith.mulf %80, %83 : vector<16x256xf32>
    %c112 = arith.constant 112 : index
    %c0_39 = arith.constant 0 : index
    %85 = vector.load %arg9[%c112, %c0_39] : memref<144x256xf32, #tpu.memory_space<vmem>>, vector<16x256xf32>
    tpu.vector_store %arg9[%c112, %c0_39], %84 {strides = array<i32>} : memref<144x256xf32, #tpu.memory_space<vmem>>, vector<16x256xf32>,
    %86 = vector.extract_strided_slice %24 {offsets = [0, 17], sizes = [16, 239], strides = [1, 1]} : vector<16x256xf32> to vector<16x239xf32>
    %87 = vector.extract_strided_slice %24 {offsets = [0, 0], sizes = [16, 17], strides = [1, 1]} : vector<16x256xf32> to vector<16x17xf32>
    %88 = tpu.concatenate %86, %87 in 1 : vector<16x239xf32>, vector<16x17xf32> -> vector<16x256xf32>
    %c8 = arith.constant 8 : index
    %c0_40 = arith.constant 0 : index
    %c0_41 = arith.constant 0 : index
    %89 = vector.load %arg7[%c8, %c0_40, %c0_41] : memref<9x1x256xf32, #tpu.memory_space<vmem>>, vector<1x1x256xf32>
    %90 = vector.shape_cast %89 : vector<1x1x256xf32> to vector<1x256xf32>
    %91 = vector.broadcast %90 : vector<1x256xf32> to vector<16x256xf32>
    %92 = arith.mulf %88, %91 : vector<16x256xf32>
    %c128 = arith.constant 128 : index
    %c0_42 = arith.constant 0 : index
    %93 = vector.load %arg9[%c128, %c0_42] : memref<144x256xf32, #tpu.memory_space<vmem>>, vector<16x256xf32>
    tpu.vector_store %arg9[%c128, %c0_42], %92 {strides = array<i32>} : memref<144x256xf32, #tpu.memory_space<vmem>>, vector<16x256xf32>,
    %c0_43 = arith.constant 0 : index
    %c0_44 = arith.constant 0 : index
    %c0_45 = arith.constant 0 : index
    %94 = vector.load %arg6[%c0_43, %c0_44, %c0_45] : memref<1x8x144xf32, #tpu.memory_space<vmem>>, vector<1x8x144xf32>
    %95 = vector.shape_cast %94 : vector<1x8x144xf32> to vector<8x144xf32>
    %c0_46 = arith.constant 0 : index
    %c0_47 = arith.constant 0 : index
    %96 = vector.load %arg9[%c0_46, %c0_47] : memref<144x256xf32, #tpu.memory_space<vmem>>, vector<144x256xf32>
    %cst_48 = arith.constant dense<0.000000e+00> : vector<8x256xf32>
    %97 = tpu.matmul %95, %96, %cst_48 {dimension_numbers = #tpu.dot_dimension_numbers<[1], [0], [0], [1], [0, 0, 1, 1], [], []>} : vector<8x144xf32>, vector<144x256xf32>, vector<8x256xf32> -> vector<8x256xf32>
    %c8_i32 = arith.constant 8 : i32
    %98 = arith.muli %arg1, %c8_i32 : i32
    %c8_i32_49 = arith.constant 8 : i32
    %99 = arith.addi %c8_i32_49, %98 : i32
    %100 = tpu.assume_multiple %99, 8 : i32
    %101 = arith.index_cast %100 : i32 to index
    %c0_50 = arith.constant 0 : index
    %102 = vector.load %arg8[%101, %c0_50] : memref<32x256xf32, #tpu.memory_space<vmem>>, vector<8x256xf32>
    tpu.vector_store %arg8[%101, %c0_50], %97 {strides = array<i32>} : memref<32x256xf32, #tpu.memory_space<vmem>>, vector<8x256xf32>,
    return
  }
  func.func @transform_0(%arg0: i32, %arg1: i32) -> (i32, i32) {
    %c0_i32 = arith.constant 0 : i32
    %c0_i32_0 = arith.constant 0 : i32
    return %c0_i32, %arg0 : i32, i32
  }
  func.func @transform_1(%arg0: i32, %arg1: i32) -> (i32, i32, i32) {
    %c0_i32 = arith.constant 0 : i32
    %c0_i32_0 = arith.constant 0 : i32
    %c0_i32_1 = arith.constant 0 : i32
    return %arg1, %c0_i32, %c0_i32_0 : i32, i32, i32
  }
  func.func @transform_2(%arg0: i32, %arg1: i32) -> (i32, i32, i32, i32) {
    %c0_i32 = arith.constant 0 : i32
    %c0_i32_0 = arith.constant 0 : i32
    %c0_i32_1 = arith.constant 0 : i32
    %c0_i32_2 = arith.constant 0 : i32
    return %arg1, %c0_i32, %c0_i32_0, %c0_i32_1 : i32, i32, i32, i32
  }
  func.func @transform_3(%arg0: i32, %arg1: i32) -> (i32, i32, i32) {
    %c0_i32 = arith.constant 0 : i32
    %c0_i32_0 = arith.constant 0 : i32
    %c0_i32_1 = arith.constant 0 : i32
    return %arg1, %c0_i32, %c0_i32_0 : i32, i32, i32
  }
  func.func @transform_4(%arg0: i32, %arg1: i32) -> (i32, i32, i32) {
    %c0_i32 = arith.constant 0 : i32
    %c0_i32_0 = arith.constant 0 : i32
    %c0_i32_1 = arith.constant 0 : i32
    return %arg1, %c0_i32, %c0_i32_0 : i32, i32, i32
  }
  func.func @transform_5(%arg0: i32, %arg1: i32) -> (i32, i32, i32) {
    %c0_i32 = arith.constant 0 : i32
    %c0_i32_0 = arith.constant 0 : i32
    %c0_i32_1 = arith.constant 0 : i32
    %c0_i32_2 = arith.constant 0 : i32
    return %c0_i32, %c0_i32_0, %c0_i32_1 : i32, i32, i32
  }
  func.func @transform_6(%arg0: i32, %arg1: i32) -> (i32, i32) {
    %c0_i32 = arith.constant 0 : i32
    %c0_i32_0 = arith.constant 0 : i32
    return %c0_i32, %arg0 : i32, i32
  }
}

</mosaic_0001>

<bundles_post_ra>
// kernel: dense_block_forward.1
= control target key start
LH: loop header
LB: loop body
LE: loop exit
PB: predicated region body
PF: predicated region fallthrough
CT: control target
= control target key end

     0   :  { %s1370_s21 = smov 0   ;;  %s1372_s22 = smov 0   ;;  %s1670_s0 = inlined_call_operand.vmem [shape: f32[8,512], index: 0, kind: input, shape index: {}]   ;;  %s1671_s1 = inlined_call_operand.vmem [shape: f32[3,16,32], index: 1, kind: input, shape index: {}]   ;;  %s1672_s2 = inlined_call_operand.vmem [shape: f32[3,2,32,1], index: 2, kind: input, shape index: {}]   ;;  %s1673_s3 = inlined_call_operand.vmem [shape: f32[3,16,1], index: 3, kind: input, shape index: {}]   ;;  %s1674_s4 = inlined_call_operand.vmem [shape: f32[3,8,144], index: 4, kind: input, shape index: {}]   ;;  %s1675_s5 = inlined_call_operand.vmem [shape: f32[9,1,256], index: 5, kind: input, shape index: {}]   ;;  %s1676_s6 = inlined_call_operand.vmem [shape: f32[32,512], index: 6, kind: output, shape index: {}]  }
   0x1   :  { %s1374_s23 = smov 0   ;;  %s1376_s24 = smov 0  }
   0x2   :  { %s1378_s25 = smov 0   ;;  %s1380_s26 = smov 0  }
   0x3   :  { %s1382_s27 = smov 0  }
   0x4 LB: > { %1680 = sst [smem:[#allocation4_spill]] %s1314_s25  ;;  %s25_s28 = sadd.s32 1, %s1314_s25  ;;  %s1322_s27 = sphi %s1382_s27, %s16_s27   ;;  %s1318_s26 = sphi %s1380_s26, %s1688_s26   ;;  %s1314_s25 = sphi %s1378_s25, %s1687_s25   ;;  %s1310_s24 = sphi %s1376_s24, %s1686_s24   ;;  %s1306_s23 = sphi %s1374_s23, %s1685_s23   ;;  %s1302_s22 = sphi %s1372_s22, %s1690_s22   ;;  %s1298_s21 = sphi %s1370_s21, %s1689_s21  }
   0x5   : > { %1681 = sst [smem:[#allocation5_spill]] %s1318_s26  ;;  %p26_p0 = scmp.ge.s32.totalorder %s25_s28, 3 }
   0x6   : > { %s28_s29 = sadd.s32 1, %s1318_s26  ;;  %s1157_s30 = sadd.s32 4294967295, %s1322_s27  }
   0x7   : > { %p196_p1 = scmp.ne.s32.totalorder %s1302_s22, %s1298_s21  ;;  %s1692_s28 = smov (%p26_p0, %s25_s28), 0 }
   0x8   : > { %1682 = sst [smem:[#allocation6_spill]] %s1692_s28  ;;  %s1694_s29 = smov (!%p26_p0, %s28_s29), %s1318_s26 }
   0x9   : > { %p197_p2 = scmp.eq.s32.totalorder %s1157_s30, 5  ;;  %p1161_p3 = scmp.ge.s32.totalorder %s1322_s27, 1 }
   0xa   : > { %p30_p4 = scmp.ge.s32.totalorder %s1694_s29, 2  ;;  %p265_p5 = scmp.lt.s32.totalorder %s1322_s27, 7 }
   0xb   : > { %p1412_p6 = por %p197_p2, %p196_p1  ;;  %s186_s9 = sadd.s32 1, %s1302_s22 }
   0xc   : > { %s1696_s29 = smov (%p30_p4, %s1694_s29), 0  ;;  %p266_p7 = pnand %p1161_p3, %p265_p5 }
   0xd   : > { %1684 = sst [smem:[#allocation7_spill]] %s1696_s29  ;;  %s183_s8 = ssub.s32 %s1318_s26, %s1696_s29 }
   0xe   : > { %p184_p8 = scmp.eq.s32.totalorder %s183_s8, 0  ;;  %269 = sbr.rel (%p266_p7) target bundleno = 762 (0x2fa), region = 44 }
   0xf   : > { %s311_s11 = sand.u32 (!%p266_p7), 1, %s1298_s21   ;;  %s1163_s12 = sshll.u32 (!%p266_p7), %s1310_s24, 1 }
  0x10   : > { %s1422_s10 = scalar_select %p184_p8, %s1302_s22, %s186_s9  }
  0x11   : > { %s1162_s13 = sshll.u32 (!%p266_p7), %s311_s11, 6  ;;  %p315_p9 = scmp.lt.s32.totalorder (!%p266_p7), %s1163_s12, 3 }
  0x12   : > { %p320_p10 = scmp.lt.s32.totalorder (!%p266_p7), %s1306_s23, 2  ;;  %s1450_s17 = scalar_lea.vmem (!%p266_p7), [#allocation3], %s1162_s13 }
  0x13   : > { %s1698_s12 = smov (!%p315_p9, %s1163_s12), 3  ;;  %p1173_p11 = scmp.ne.s32.totalorder %s1306_s23, 0 }
  0x14   : > { %s321_s14 = scalar_select %p320_p10, %s1306_s23, 2 }
  0x15   : > { %s1164_s15 = sshll.u32 %s1698_s12, 3  ;;  %344 = sbr.rel (%p1173_p11) target bundleno = 31 (0x1f), region = 48 }
  0x16   : > { %s318_s18 = scalar_lea.vmem %s1670_s0, %s1164_s15  ;;  %s1193_s19 = sshll.u32 %s321_s14, 4 }
  0x17   : > { %s1433_s8 = scalar_lea.vmem %s1671_s1, %s1193_s19  ;;  %s1194_s21 = sshll.u32 %s321_s14, 6 }
  0x18   : > { %s1438_s11 = scalar_lea.vmem %s1672_s2, %s1194_s21  ;;  %s1443_s12 = scalar_lea.vmem %s1673_s3, %s1193_s19 }
  0x19   : > { %s1448_s15 = scalar_lea.vmem %s1674_s4, %s1193_s19 }
  0x1a   : > { %v353_v0 = vld [vmem:[%s318_s18] sm:$0xff]  ;;  %v354_v1 = vld [vmem:[%s318_s18 + $0x8] sm:$0xff]  ;;  %v1324_v2 = vmov 0.0  }
  0x1b   : > { %347 = vst [vmem:[%s1450_s17 + $0x10] sm:$0xff] %v1324_v2  ;;  %348 = vst [vmem:[%s1450_s17 + $0x18] sm:$0xff] %v1324_v2 }
  0x1c   : > { %349 = vst [vmem:[%s1450_s17 + $0x20] sm:$0xff] %v1324_v2  ;;  %350 = vst [vmem:[%s1450_s17 + $0x28] sm:$0xff] %v1324_v2 }
  0x1d   : > { %351 = vst [vmem:[%s1450_s17 + $0x30] sm:$0xff] %v1324_v2  ;;  %352 = vst [vmem:[%s1450_s17 + $0x38] sm:$0xff] %v1324_v2 }
  0x1e   : > { %355 = vst [vmem:[%s1450_s17] sm:$0xff] %v353_v0  ;;  %356 = vst [vmem:[%s1450_s17 + $0x8] sm:$0xff] %v354_v1 }
  0x1f PF: > { %v372_v3 = vld [vmem:[%s1438_s11 + $0x38] sm:$0xff]  ;;  %v1325_v5 = vmov 0   ;;  %v367_v6 = vld [vmem:[%s1438_s11 + $0x10] sm:$0xff]  ;;  %v366_v7 = vld [vmem:[%s1438_s11 + $0x8] sm:$0xff]  ;;  %v1326_v14 = vmov 0.0   ;;  %vm451_vm0 = vcmask 261120  }
  0x20   : > { %v368_v4 = vld [vmem:[%s1438_s11 + $0x18] sm:$0xff]  ;;  %1267 = vset.pattern.permute.xlu1 %v1325_v5  ;;  %1266 = vset.pattern.permute.xlu0 %v1325_v5  ;;  %v371_v8 = vld [vmem:[%s1438_s11 + $0x30] sm:$0xff]  ;;  %v365_v9 = vld [vmem:[%s1438_s11] sm:$0xff]  ;;  %s1327_s25 = smov 1   ;;  %s1328_s26 = smov 112   ;;  %vm592_vm1 = vcmask 130048  }
  0x21   : > { %418 = vperm.xlu1 %1267, %v372_v3   ;;  %390 = vperm.xlu0 %1266, %v368_v4   ;;  %v370_v10 = vld [vmem:[%s1438_s11 + $0x28] sm:$0xff]  ;;  %v369_v11 = vld [vmem:[%s1438_s11 + $0x20] sm:$0xff]  ;;  %s1329_s28 = smov 113   ;;  %s1330_s29 = smov 127   ;;  %vm811_vm2 = vcmask 916480   ;;  %vm771_vm3 = vcmask 924672  }
  0x22   : > { %v440_v12 = vld [vmem:[%s1443_s12 + $0x8] sm:$0xff]  ;;  %v439_v13 = vld [vmem:[%s1443_s12] sm:$0xff]  ;;  %522 = vmatprep.mubr.f32.mxu0 %v1326_v14  ;;  %v359_v31 = vld [vmem:[%s1450_s17 + $0x10] sm:$0xff]  ;;  %s1331_s13 = smov 15   ;;  %s1332_s14 = smov 16   ;;  %vm731_vm4 = vcmask 1039360  }
  0x23   : > { %v361_v24 = vld [vmem:[%s1450_s17 + $0x20] sm:$0xff]  ;;  %v362_v25 = vld [vmem:[%s1450_s17 + $0x28] sm:$0xff]  ;;  %v360_v32 = vld [vmem:[%s1450_s17 + $0x18] sm:$0xff]  ;;  %s1333_s18 = smov 17   ;;  %s1334_s19 = smov 111   ;;  %vm672_vm5 = vcmask 7168  }
  0x24   : > { %v363_v15 = vld [vmem:[%s1450_s17 + $0x30] sm:$0xff]  ;;  %v364_v16 = vld [vmem:[%s1450_s17 + $0x38] sm:$0xff]  ;;  %v437_v55 = vld [vmem:[%s1433_s8] sm:$0xff]  ;;  %vm632_vm6 = vcmask 121856   ;;  %vm553_vm7 = vcmask 138240   ;;  %vm851_vm8 = vcmask 908288  }
  0x25   : > { %385 = vperm.xlu0 %1266, %v367_v6   ;;  %380 = vperm.xlu1 %1267, %v366_v7   ;;  %v358_v35 = vld [vmem:[%s1450_s17 + $0x8] sm:$0xff]  ;;  %v357_v38 = vld [vmem:[%s1450_s17] sm:$0xff] }
  0x26   : > { %v438_v56 = vld [vmem:[%s1433_s8 + $0x8] sm:$0xff]  ;;  %s1185_s8 = sshll.u32 %s1306_s23, 3  ;;  %s1198_s23 = sshll.u32 (%p1412_p6), %s1310_s24, 4 }
  0x27   : > { %v884_v7 = vld [vmem:[%s1448_s15 + $0x8] sm:$0xff]  ;;  %s996_s21 = sadd.s32 8, %s1185_s8 }
  0x28   : > { %1184 = vmatprep.mubr.msk.f32.mxu1 %vm592_vm1, %v884_v7  ;;  %v1178_v7 = vld [vmem:[%s1675_s5 + $0x6] sm:$0x3]  ;;  %s997_s9 = sshra.s32 %s996_s21, 3 }
  0x29   : > { %413 = vperm.xlu0 %1266, %v371_v8   ;;  %375 = vperm.xlu1 %1267, %v365_v9   ;;  %s1197_s11 = sshll.u32 %s997_s9, 4 }
  0x2a   : > { %s1001_s12 = scalar_lea.vmem %s1450_s17, %s1197_s11 [#allocation3] }
  0x2d   : > { %408 = vperm.xlu0 %1266, %v370_v10   ;;  %403 = vperm.xlu1 %1267, %v369_v11  }
  0x31   : > { %448 = vperm.xlu0 %1266, %v440_v12   ;;  %443 = vperm.xlu1 %1267, %v439_v13  }
  0x9c   : > { %v419_v17 = vpop.permute.xlu1 %418  ;;  %v391_v18 = vpop.permute.xlu0 %390 }
  0x9d   : > { %v399_v19 = vmul.f32 %v391_v18, %v363_v15  ;;  %v400_v20 = vmul.f32 %v391_v18, %v364_v16  ;;  %v564_v16 = vlaneseq }
  0x9f   : > { %v428_v21 = vadd.f32 %v419_v17, %v400_v20  ;;  %v427_v22 = vadd.f32 %v419_v17, %v399_v19  ;;  %v565_v19 = vshrl.u32 %v564_v16, 7 }
  0xa0   : > { %v386_v23 = vpop.permute.xlu0 %385  ;;  %v381_v26 = vpop.permute.xlu1 %380 }
  0xa1   : > { %v436_v27 = vmax.f32 %v428_v21, 0.0  ;;  %v435_v28 = vmax.f32 %v427_v22, 0.0  ;;  %v397_v29 = vmul.f32 %v386_v23, %v361_v24  ;;  %v398_v30 = vmul.f32 %v386_v23, %v362_v25  ;;  %v1182_v22 = vld [vmem:[%s1675_s5 + $0xe] sm:$0x3] }
  0xa2   : > { %v395_v39 = vmul.f32 %v381_v26, %v359_v31  ;;  %v396_v40 = vmul.f32 %v381_v26, %v360_v32  ;;  %v1540_v23 = vsub.s32 0, %v565_v19  ;;  %v1542_v24 = vsub.s32 1, %v565_v19 }
  0xa3   : > { %482 = vmatprep.subr.mxu0 %v436_v27 }
  0xa4   : > { %v414_v33 = vpop.permute.xlu0 %413  ;;  %v376_v34 = vpop.permute.xlu1 %375  ;;  %483 = vmatpush1.msra.mxu0 %v435_v28  ;;  %v828_v25 = vrot.slane %v1182_v22, %v1540_v23  ;;  %v832_v28 = vrot.slane %v1182_v22, %v1542_v24 }
  0xa5   : > { %v425_v36 = vadd.f32 %v414_v33, %v397_v29  ;;  %v426_v37 = vadd.f32 %v414_v33, %v398_v30  ;;  %v394_v43 = vmul.f32 %v376_v34, %v358_v35  ;;  %v393_v44 = vmul.f32 %v376_v34, %v357_v38  ;;  %v1181_v30 = vld [vmem:[%s1675_s5 + $0xc] sm:$0x3] }
  0xa7   : > { %v433_v41 = vmax.f32 %v425_v36, 0.0  ;;  %v434_v42 = vmax.f32 %v426_v37, 0.0  ;;  %v788_v36 = vrot.slane %v1181_v30, %v1540_v23  ;;  %v792_v37 = vrot.slane %v1181_v30, %v1542_v24 }
  0xa8   : > { %v409_v45 = vpop.permute.xlu0 %408  ;;  %v404_v46 = vpop.permute.xlu1 %403 }
  0xa9   : > { %v423_v47 = vadd.f32 %v409_v45, %v395_v39  ;;  %v424_v48 = vadd.f32 %v409_v45, %v396_v40  ;;  %v422_v49 = vadd.f32 %v404_v46, %v394_v43  ;;  %484 = vmatprep.subr.mxu0 %v434_v42  ;;  %v421_v50 = vadd.f32 %v404_v46, %v393_v44  ;;  %v1180_v43 = vld [vmem:[%s1675_s5 + $0xa] sm:$0x3] }
  0xaa   : > { %485 = vmatpush1.msra.mxu0 %v433_v41 }
  0xab   : > { %v431_v51 = vmax.f32 %v423_v47, 0.0  ;;  %v432_v52 = vmax.f32 %v424_v48, 0.0  ;;  %v430_v53 = vmax.f32 %v422_v49, 0.0  ;;  %v429_v54 = vmax.f32 %v421_v50, 0.0 }
  0xac   : > { %v444_v57 = vpop.permute.xlu1 %443  ;;  %v449_v1 = vpop.permute.xlu0 %448  ;;  %v748_v50 = vrot.slane %v1180_v43, %v1540_v23 }
  0xad   : > { %486 = vmatprep.subr.mxu0 %v432_v52 }
  0xae   : > { %487 = vmatpush1.msra.mxu0 %v431_v51  ;;  %v752_v51 = vrot.slane %v1180_v43, %v1542_v24 }
  0xaf   : > { %488 = vmatprep.subr.mxu0 %v430_v53 }
  0xb0   : > { %489 = vmatpush1.msra.mxu0 %v429_v54 }
  0xb1   : > { %1174 = vmatmul.mubr.msk.f32.vlgmr.msra.gmra.mxu0 %vm451_vm0, %v437_v55 }
  0xb2   : > { %528 = vmatprep.mubr.f32.mxu0 %v1326_v14 }
  0xb5   : > { %1175 = vmatmul.mubr.msk.f32.gmra.mxu0 %vm451_vm0, %v438_v56 }
 0x171   : > { %v524_v58 = vpop.f32.mrf.mxu0 }
 0x172   : > { %v525_v59 = vadd.f32 %v524_v58, %v444_v57 }
 0x173   : > { %v526_v60 = vpop.f32.mrf.mxu0 }
 0x174   : > { %v1481_v61 = vmax.f32 %v525_v59, 0.0  ;;  %v527_v62 = vadd.f32 %v526_v60, %v444_v57 }
 0x175   : > { %v530_v0 = vpop.f32.mrf.mxu0 }
 0x176   : > { %668 = vrot.lane.b32.xlu1 %v1481_v61, %s1327_s25  ;;  %803 = vrot.lane.b32.xlu0 %v1481_v61, %s1328_s26  ;;  %v1486_v63 = vmax.f32 %v527_v62, 0.0  ;;  %v531_v2 = vadd.f32 %v530_v0, %v449_v1  ;;  %v1179_v62 = vld [vmem:[%s1675_s5 + $0x8] sm:$0x3] }
 0x177   : > { %v532_v4 = vpop.f32.mrf.mxu0 }
 0x178   : > { %v1495_v3 = vmax.f32 %v531_v2, 0.0  ;;  %v533_v5 = vadd.f32 %v532_v4, %v449_v1  ;;  %v712_v4 = vrot.slane %v1179_v62, %v1542_v24 }
 0x17a   : > { %805 = vrot.lane.b32.xlu1 %v1486_v63, %s1328_s26  ;;  %763 = vrot.lane.b32.xlu0 %v1481_v61, %s1329_s28  ;;  %v1502_v6 = vmax.f32 %v533_v5, 0.0  ;;  %v716_v19 = vmul.f32 %v712_v4, %v1486_v63 }
 0x17e   : > { %765 = vrot.lane.b32.xlu1 %v1486_v63, %s1329_s28  ;;  %723 = vrot.lane.b32.xlu0 %v1481_v61, %s1330_s29 }
 0x182   : > { %725 = vrot.lane.b32.xlu1 %v1486_v63, %s1330_s29  ;;  %662 = vrot.lane.b32.xlu0 %v1486_v63, %s1327_s25 }
 0x186   : > { %670 = vrot.lane.b32.xlu1 %v1495_v3, %s1327_s25  ;;  %622 = vrot.lane.b32.xlu0 %v1486_v63, %s1331_s13 }
 0x18a   : > { %630 = vrot.lane.b32.xlu1 %v1495_v3, %s1331_s13  ;;  %807 = vrot.lane.b32.xlu0 %v1495_v3, %s1328_s26 }
 0x18e   : > { %809 = vrot.lane.b32.xlu1 %v1502_v6, %s1328_s26  ;;  %767 = vrot.lane.b32.xlu0 %v1495_v3, %s1329_s28 }
 0x192   : > { %769 = vrot.lane.b32.xlu1 %v1502_v6, %s1329_s28  ;;  %727 = vrot.lane.b32.xlu0 %v1495_v3, %s1330_s29 }
 0x196   : > { %729 = vrot.lane.b32.xlu1 %v1502_v6, %s1330_s29  ;;  %582 = vrot.lane.b32.xlu0 %v1486_v63, %s1332_s14 }
 0x19a   : > { %628 = vrot.lane.b32.xlu1 %v1481_v61, %s1331_s13  ;;  %541 = vrot.lane.b32.xlu0 %v1486_v63, %s1333_s18 }
 0x19e   : > { %590 = vrot.lane.b32.xlu1 %v1495_v3, %s1332_s14  ;;  %664 = vrot.lane.b32.xlu0 %v1502_v6, %s1327_s25  ;;  %s1013_s25 = scalar_lea.vmem (%p1412_p6), %s1676_s6, %s1198_s23 }
 0x1a2   : > { %588 = vrot.lane.b32.xlu1 %v1481_v61, %s1332_s14  ;;  %624 = vrot.lane.b32.xlu0 %v1502_v6, %s1331_s13 }
 0x1a6   : > { %551 = vrot.lane.b32.xlu1 %v1495_v3, %s1333_s18  ;;  %584 = vrot.lane.b32.xlu0 %v1502_v6, %s1332_s14 }
 0x1aa   : > { %549 = vrot.lane.b32.xlu1 %v1481_v61, %s1333_s18  ;;  %543 = vrot.lane.b32.xlu0 %v1502_v6, %s1333_s18 }
 0x1ae   : > { %849 = vrot.lane.b32.xlu1 %v1502_v6, %s1334_s19  ;;  %847 = vrot.lane.b32.xlu0 %v1495_v3, %s1334_s19 }
 0x1b2   : > { %845 = vrot.lane.b32.xlu1 %v1486_v63, %s1334_s19  ;;  %843 = vrot.lane.b32.xlu0 %v1481_v61, %s1334_s19 }
 0x1e8   : > { %v1527_v8 = vpop.permute.xlu1 %668  ;;  %v804_v9 = vpop.permute.xlu0 %803 }
 0x1ec   : > { %v806_v10 = vpop.permute.xlu1 %805  ;;  %v764_v11 = vpop.permute.xlu0 %763 }
 0x1ed   : > { %v820_v29 = vsel %vm811_vm2, %v806_v10, %v804_v9  ;;  %v812_v33 = vsel %vm811_vm2, %v804_v9, %v806_v10  ;;  %v708_v9 = vrot.slane %v1179_v62, %v1540_v23  ;;  %v718_v10 = vmul.f32 %v712_v4, %v1502_v6  ;;  %v1177_v6 = vld [vmem:[%s1675_s5 + $0x4] sm:$0x3] }
 0x1ee   : > { %v836_v40 = vmul.f32 %v832_v28, %v820_v29  ;;  %v835_v41 = vmul.f32 %v828_v25, %v812_v33  ;;  %v647_v29 = vrot.slane %v1177_v6, %v1540_v23  ;;  %v651_v30 = vrot.slane %v1177_v6, %v1542_v24 }
 0x1f0   : > { %v766_v12 = vpop.permute.xlu1 %765  ;;  %v724_v13 = vpop.permute.xlu0 %723 }
 0x1f1   : > { %v780_v42 = vsel %vm771_vm3, %v766_v12, %v764_v11  ;;  %v772_v46 = vsel %vm771_vm3, %v764_v11, %v766_v12  ;;  %v717_v11 = vmul.f32 %v708_v9, %v1495_v3  ;;  %v687_v12 = vrot.slane %v1178_v7, %v1540_v23 }
 0x1f2   : > { %v796_v49 = vmul.f32 %v792_v37, %v780_v42  ;;  %v795_v54 = vmul.f32 %v788_v36, %v772_v46  ;;  %v1183_v46 = vld [vmem:[%s1675_s5 + $0x10] sm:$0x3] }
 0x1f4   : > { %v726_v14 = vpop.permute.xlu1 %725  ;;  %v1529_v15 = vpop.permute.xlu0 %662 }
 0x1f5   : > { %v740_v55 = vsel %vm731_vm4, %v726_v14, %v724_v13  ;;  %v732_v58 = vsel %vm731_vm4, %v724_v13, %v726_v14  ;;  %v691_v13 = vrot.slane %v1178_v7, %v1542_v24  ;;  %v679_v63 = vsel %vm672_vm5, %v1529_v15, %v1527_v8 }
 0x1f6   : > { %v756_v0 = vmul.f32 %v752_v51, %v740_v55  ;;  %v755_v5 = vmul.f32 %v748_v50, %v732_v58  ;;  %v868_v55 = vrot.slane %v1183_v46, %v1540_v23 }
 0x1f8   : > { %v1531_v17 = vpop.permute.xlu1 %670  ;;  %v1533_v18 = vpop.permute.xlu0 %622 }
 0x1fc   : > { %v1535_v20 = vpop.permute.xlu1 %630  ;;  %v808_v21 = vpop.permute.xlu0 %807 }
 0x200   : > { %v810_v26 = vpop.permute.xlu1 %809  ;;  %v768_v27 = vpop.permute.xlu0 %767 }
 0x201   : > { %v813_v31 = vsel %vm811_vm2, %v808_v21, %v810_v26  ;;  %v821_v32 = vsel %vm811_vm2, %v810_v26, %v808_v21  ;;  %v673_v21 = vsel %vm672_vm5, %v1527_v8, %v1529_v15 }
 0x202   : > { %v838_v34 = vmul.f32 %v832_v28, %v821_v32  ;;  %v837_v35 = vmul.f32 %v828_v25, %v813_v31  ;;  %v715_v25 = vmul.f32 %v708_v9, %v1481_v61  ;;  %v695_v28 = vmul.f32 %v691_v13, %v673_v21 }
 0x203   : > { %v694_v32 = vmul.f32 %v687_v12, %v679_v63 }
 0x204   : > { %v770_v38 = vpop.permute.xlu1 %769  ;;  %924 = vmatprep.subr.mxu1 %v838_v34  ;;  %v728_v39 = vpop.permute.xlu0 %727  ;;  %v562_v34 = vld [vmem:[%s1675_s5] sm:$0x3] }
 0x205   : > { %v773_v44 = vsel %vm771_vm3, %v768_v27, %v770_v38  ;;  %v781_v45 = vsel %vm771_vm3, %v770_v38, %v768_v27  ;;  %925 = vmatpush1.msra.mxu1 %v837_v35 }
 0x206   : > { %v797_v47 = vmul.f32 %v788_v36, %v773_v44  ;;  %v798_v48 = vmul.f32 %v792_v37, %v781_v45  ;;  %926 = vmatprep.subr.mxu1 %v836_v40 }
 0x207   : > { %927 = vmatpush1.msra.mxu1 %v835_v41 }
 0x208   : > { %v730_v52 = vpop.permute.xlu1 %729  ;;  %928 = vmatprep.subr.mxu1 %v798_v48  ;;  %v1556_v53 = vpop.permute.xlu0 %582 }
 0x209   : > { %v733_v56 = vsel %vm731_vm4, %v728_v39, %v730_v52  ;;  %v741_v57 = vsel %vm731_vm4, %v730_v52, %v728_v39  ;;  %929 = vmatpush1.msra.mxu1 %v797_v47 }
 0x20a   : > { %v757_v59 = vmul.f32 %v748_v50, %v733_v56  ;;  %v758_v60 = vmul.f32 %v752_v51, %v741_v57  ;;  %930 = vmatprep.subr.mxu1 %v796_v49  ;;  %v571_v50 = vrot.slane %v562_v34, %v1542_v24 }
 0x20b   : > { %931 = vmatpush1.msra.mxu1 %v795_v54 }
 0x20c   : > { %v629_v1 = vpop.permute.xlu1 %628  ;;  %932 = vmatprep.subr.mxu1 %v758_v60  ;;  %v1565_v2 = vpop.permute.xlu0 %541 }
 0x20d   : > { %933 = vmatpush1.msra.mxu1 %v757_v59  ;;  %v633_v8 = vsel %vm632_vm6, %v629_v1, %v1533_v18  ;;  %v639_v35 = vsel %vm632_vm6, %v1533_v18, %v629_v1 }
 0x20e   : > { %934 = vmatprep.subr.mxu1 %v756_v0  ;;  %v655_v39 = vmul.f32 %v651_v30, %v633_v8  ;;  %v654_v43 = vmul.f32 %v647_v29, %v639_v35  ;;  %v872_v0 = vrot.slane %v1183_v46, %v1542_v24 }
 0x20f   : > { %935 = vmatpush1.msra.mxu1 %v755_v5 }
 0x210   : > { %v591_v14 = vpop.permute.xlu1 %590  ;;  %936 = vmatprep.subr.mxu1 %v718_v10  ;;  %v665_v16 = vpop.permute.xlu0 %664 }
 0x211   : > { %v674_v3 = vsel %vm672_vm5, %v1531_v17, %v665_v16  ;;  %v680_v22 = vsel %vm672_vm5, %v665_v16, %v1531_v17  ;;  %937 = vmatpush1.msra.mxu1 %v717_v11  ;;  %v1176_v17 = vld [vmem:[%s1675_s5 + $0x2] sm:$0x3] }
 0x212   : > { %v696_v26 = vmul.f32 %v687_v12, %v680_v22  ;;  %v697_v27 = vmul.f32 %v691_v13, %v674_v3  ;;  %938 = vmatprep.subr.mxu1 %v716_v19  ;;  %v607_v38 = vrot.slane %v1176_v17, %v1540_v23  ;;  %v611_v40 = vrot.slane %v1176_v17, %v1542_v24  ;;  %v883_v19 = vld [vmem:[%s1448_s15] sm:$0xff] }
 0x213   : > { %939 = vmatpush1.msra.mxu1 %v715_v25 }
 0x214   : > { %v589_v31 = vpop.permute.xlu1 %588  ;;  %v625_v61 = vpop.permute.xlu0 %624  ;;  %940 = vmatprep.subr.mxu1 %v697_v27 }
 0x215   : > { %v634_v15 = vsel %vm632_vm6, %v1535_v20, %v625_v61  ;;  %v640_v33 = vsel %vm632_vm6, %v625_v61, %v1535_v20  ;;  %941 = vmatpush1.msra.mxu1 %v696_v26  ;;  %v567_v20 = vrot.slane %v562_v34, %v1540_v23  ;;  %v593_v44 = vsel %vm592_vm1, %v589_v31, %v1556_v53 }
 0x216   : > { %v656_v36 = vmul.f32 %v647_v29, %v640_v33  ;;  %v657_v37 = vmul.f32 %v651_v30, %v634_v15  ;;  %942 = vmatprep.subr.mxu1 %v695_v28  ;;  %v599_v47 = vsel %vm592_vm1, %v1556_v53, %v589_v31  ;;  %v615_v51 = vmul.f32 %v611_v40, %v593_v44 }
 0x217   : > { %943 = vmatpush1.msra.mxu1 %v694_v32  ;;  %v614_v56 = vmul.f32 %v607_v38, %v599_v47 }
 0x218   : > { %v552_v41 = vpop.permute.xlu1 %551  ;;  %v585_v42 = vpop.permute.xlu0 %584  ;;  %944 = vmatprep.subr.mxu1 %v657_v37 }
 0x219   : > { %v594_v18 = vsel %vm592_vm1, %v591_v14, %v585_v42  ;;  %v600_v45 = vsel %vm592_vm1, %v585_v42, %v591_v14  ;;  %945 = vmatpush1.msra.mxu1 %v656_v36 }
 0x21a   : > { %v616_v48 = vmul.f32 %v607_v38, %v600_v45  ;;  %v617_v49 = vmul.f32 %v611_v40, %v594_v18  ;;  %946 = vmatprep.subr.mxu1 %v655_v39 }
 0x21b   : > { %947 = vmatpush1.msra.mxu1 %v654_v43 }
 0x21c   : > { %v550_v52 = vpop.permute.xlu1 %549  ;;  %v544_v54 = vpop.permute.xlu0 %543  ;;  %948 = vmatprep.subr.mxu1 %v617_v49 }
 0x21d   : > { %v554_v57 = vsel %vm553_vm7, %v550_v52, %v1565_v2  ;;  %v555_v58 = vsel %vm553_vm7, %v552_v41, %v544_v54  ;;  %v561_v53 = vsel %vm553_vm7, %v544_v54, %v552_v41  ;;  %949 = vmatpush1.msra.mxu1 %v616_v48  ;;  %v560_v59 = vsel %vm553_vm7, %v1565_v2, %v550_v52 }
 0x21e   : > { %v576_v60 = vmul.f32 %v567_v20, %v561_v53  ;;  %v577_v62 = vmul.f32 %v571_v50, %v555_v58  ;;  %950 = vmatprep.subr.mxu1 %v615_v51  ;;  %v575_v1 = vmul.f32 %v571_v50, %v554_v57  ;;  %v574_v5 = vmul.f32 %v567_v20, %v560_v59 }
 0x21f   : > { %951 = vmatpush1.msra.mxu1 %v614_v56 }
 0x220   : > { %v850_v23 = vpop.permute.xlu1 %849  ;;  %v848_v4 = vpop.permute.xlu0 %847  ;;  %952 = vmatprep.subr.mxu1 %v577_v62 }
 0x221   : > { %v853_v7 = vsel %vm851_vm8, %v848_v4, %v850_v23  ;;  %v861_v9 = vsel %vm851_vm8, %v850_v23, %v848_v4  ;;  %953 = vmatpush1.msra.mxu1 %v576_v60 }
 0x222   : > { %v877_v10 = vmul.f32 %v868_v55, %v853_v7  ;;  %v878_v2 = vmul.f32 %v872_v0, %v861_v9  ;;  %954 = vmatprep.subr.mxu1 %v575_v1 }
 0x223   : > { %955 = vmatpush1.msra.mxu1 %v574_v5 }
 0x224   : > { %v846_v11 = vpop.permute.xlu1 %845  ;;  %v844_v24 = vpop.permute.xlu0 %843  ;;  %984 = vmatprep.subr.mxu1 %v878_v2 }
 0x225   : > { %v852_v12 = vsel %vm851_vm8, %v844_v24, %v846_v11  ;;  %v860_v13 = vsel %vm851_vm8, %v846_v11, %v844_v24  ;;  %985 = vmatpush2.msra.mxu1 %v877_v10 }
 0x226   : > { %v875_v14 = vmul.f32 %v868_v55, %v852_v12  ;;  %v876_v16 = vmul.f32 %v872_v0, %v860_v13 }
 0x228   : > { %986 = vmatprep.subr.mxu1 %v876_v16 }
 0x229   : > { %987 = vmatpush2.msra.mxu1 %v875_v14 }
 0x22a   : > { %989 = vmatmul.mubr.f32.vlgmr.msra.gmra.mxu1 %v883_v19 }
 0x2e9   : > { %1010 = sbr.rel (!%p1412_p6) target bundleno = 762 (0x2fa), region = 52 }
 0x2ea   : > { %v990_v21 = vpop.f32.mrf.mxu1 }
 0x2eb   : > { %1002 = vst [vmem:[%s1001_s12] sm:$0xff] %v990_v21 }
 0x2ec   : > { %v992_v6 = vpop.f32.mrf.mxu1 }
 0x2ed   : > { %1003 = vst [vmem:[%s1001_s12 + $0x8] sm:$0xff] %v992_v6 }
 0x2f4   : > { %v1026_v3 = vld [vmem:[%s1450_s17] sm:$0xff]  ;;  %v1028_v22 = vld [vmem:[%s1450_s17 + $0x8] sm:$0xff]  ;;  %v1030_v25 = vld [vmem:[%s1450_s17 + $0x10] sm:$0xff] }
 0x2f5   : > { %v1032_v63 = vld [vmem:[%s1450_s17 + $0x18] sm:$0xff]  ;;  %v1034_v26 = vld [vmem:[%s1450_s17 + $0x20] sm:$0xff]  ;;  %v1036_v27 = vld [vmem:[%s1450_s17 + $0x28] sm:$0xff]  ;;  %1027 = vst [vmem:[%s1013_s25] sm:$0xff] %v1026_v3 }
 0x2f6   : > { %1029 = vst [vmem:[%s1013_s25 + $0x8] sm:$0xff] %v1028_v22  ;;  %1031 = vst [vmem:[%s1013_s25 + $0x20] sm:$0xff] %v1030_v25  ;;  %v1038_v28 = vld [vmem:[%s1450_s17 + $0x30] sm:$0xff]  ;;  %v1040_v29 = vld [vmem:[%s1450_s17 + $0x38] sm:$0xff] }
 0x2f7   : > { %1033 = vst [vmem:[%s1013_s25 + $0x28] sm:$0xff] %v1032_v63  ;;  %1035 = vst [vmem:[%s1013_s25 + $0x40] sm:$0xff] %v1034_v26 }
 0x2f8   : > { %1037 = vst [vmem:[%s1013_s25 + $0x48] sm:$0xff] %v1036_v27  ;;  %1039 = vst [vmem:[%s1013_s25 + $0x60] sm:$0xff] %v1038_v28 }
 0x2f9   : > { %1041 = vst [vmem:[%s1013_s25 + $0x68] sm:$0xff] %v1040_v29 }
 0x2fa PF: > { %s16_s27 = sadd.s32 1, %s1322_s27   ;;  %s1685_s23 = sld [smem:[#allocation4_spill]] }
 0x2fb   : > { %p13_p12 = scmp.ge.s32.totalorder %s16_s27, 8   ;;  %s1686_s24 = sld [smem:[#allocation5_spill]] }
 0x2fc   : > { %s1687_s25 = sld [smem:[#allocation6_spill]]  ;;  %s1689_s21 = smov %s1302_s22 }
 0x2fd   : > { %s1688_s26 = sld [smem:[#allocation7_spill]]  ;;  %s1690_s22 = smov %s1422_s10 }
 0x2fe   :  { %15 = sbr.rel (!%p13_p12) target bundleno = 4 (0x4), region = 122 }

</bundles_post_ra>
